<compile_context>
chip_gen: v7x
topology: tpu7x:2x2x1
jax: 0.10.0
libtpu: 0.0.40
codegen_flags: <defaults>
</compile_context>

<pallas_src>
import functools

import jax
import jax.numpy as jnp
from jax.experimental import pallas as pl
from jax.experimental.pallas import tpu as pltpu

_LANES = 128
_SUBLANES = 8


def _focal_pointwise(x, t, *, alpha, gamma, in_kernel):
    """Numerically stable per-element focal loss (f32 in, f32 out)."""
    # Shared exponential: feeds both the stable BCE and the sigmoid.
    e = jnp.exp(-jnp.abs(x))
    # binary_cross_entropy_with_logits, stable: max(x,0) - x*t + log1p(exp(-|x|))
    ce = jnp.maximum(x, 0.0) - x * t + jnp.log1p(e)
    # sigmoid(x): 1/(1+e) for x>=0, e/(1+e) for x<0.  Inside the kernel use the
    # EUP reciprocal (exact) instead of a multi-op VALU divide.
    if in_kernel:
        inv = pl.reciprocal(1.0 + e, approx=False)
    else:
        inv = 1.0 / (1.0 + e)
    p = jnp.where(x >= 0.0, 1.0, e) * inv
    # 1 - p_t = 1 - (p*t + (1-p)*(1-t)) = p + t - 2*p*t
    m = p + t - 2.0 * p * t

    g = float(gamma)
    if g == int(g) and 0 <= int(g) <= 4:
        ig = int(g)
        if ig == 0:
            mod = jnp.ones_like(m)
        else:
            mod = m
            for _ in range(ig - 1):  # gamma==2 -> single m*m
                mod = mod * m
    else:
        mod = m ** jnp.float32(g)

    loss = ce * mod
    if alpha >= 0:
        # alpha_t = alpha*t + (1-alpha)*(1-t) = (1-alpha) + (2*alpha-1)*t
        loss = ((1.0 - alpha) + (2.0 * alpha - 1.0) * t) * loss
    return loss


def _focal_loss_kernel(x_ref, t_ref, o_ref, *, alpha, gamma, row_tile, k_acc):
    j = pl.program_id(1)

    @pl.when(j == 0)
    def _():
        o_ref[...] = jnp.zeros_like(o_ref)

    x = x_ref[...].astype(jnp.float32)
    t = t_ref[...].astype(jnp.float32)

    loss = _focal_pointwise(x, t, alpha=alpha, gamma=gamma, in_kernel=True)

    # K independent (8,128) partial accumulators: whole-vreg VPU adds, extra
    # ILP on the accumulation chain.  Cross-lane reduction deferred to wrapper.
    part = loss.reshape(row_tile // (_SUBLANES * k_acc), k_acc, _SUBLANES, _LANES).sum(axis=0)
    o_ref[...] += part[None]


def focal_loss(inputs, targets, alpha=0.25, gamma=2.0, *, max_row_tile=8192):
    assert inputs.shape == targets.shape
    alpha = float(alpha)
    gamma = float(gamma)
    total_n = inputs.size

    x_flat = inputs.reshape(-1)
    t_flat = targets.reshape(-1)

    rows = total_n // _LANES                       # full 128-lane rows
    num_par = 2 if rows >= 2 * _SUBLANES else 1    # v7x: shard stream over both TCs
    rows_per_group = rows // max(num_par, 1)
    row_tile = min(max_row_tile, (rows_per_group // _SUBLANES) * _SUBLANES)

    total = jnp.float32(0.0)
    n_main = 0

    if row_tile >= _SUBLANES:
        inner = rows_per_group // row_tile
        rows_main = num_par * inner * row_tile     # rows covered by the kernel grid
        n_main = rows_main * _LANES

        if total_n % _LANES == 0:
            # Pure bitcast reshape: no HBM copy.  The grid simply never reads
            # rows >= rows_main; those are handled by the jnp tail below.
            x2 = x_flat.reshape(rows, _LANES)
            t2 = t_flat.reshape(rows, _LANES)
        else:
            # TODO(synk): element counts not divisible by 128 pay one prefix-slice
            # copy here; a masked last tile would avoid it.
            x2 = x_flat[: rows * _LANES].reshape(rows, _LANES)
            t2 = t_flat[: rows * _LANES].reshape(rows, _LANES)

        k_acc = next(d for d in (8, 4, 2, 1) if (row_tile // _SUBLANES) % d == 0)

        kernel = functools.partial(
            _focal_loss_kernel, alpha=alpha, gamma=gamma,
            row_tile=row_tile, k_acc=k_acc,
        )

        # 2 inputs x 2 pipeline buffers per input block, plus small slack.
        needed = 2 * 2 * row_tile * _LANES * 4 + (4 << 20)
        vmem_limit = max(32 * 1024 * 1024, needed)

        partials = pl.pallas_call(
            kernel,
            out_shape=jax.ShapeDtypeStruct(
                (num_par, k_acc, _SUBLANES, _LANES), jnp.float32),
            grid_spec=pltpu.PrefetchScalarGridSpec(
                num_scalar_prefetch=0,
                grid=(num_par, inner),
                in_specs=[
                    pl.BlockSpec((row_tile, _LANES), lambda i, j: (i * inner + j, 0)),
                    pl.BlockSpec((row_tile, _LANES), lambda i, j: (i * inner + j, 0)),
                ],
                out_specs=pl.BlockSpec(
                    (1, k_acc, _SUBLANES, _LANES), lambda i, j: (i, 0, 0, 0)),
            ),
            compiler_params=pltpu.CompilerParams(
                dimension_semantics=("parallel", "arbitrary"),
                vmem_limit_bytes=vmem_limit,
            ),
        )(x2, t2)
        total = partials.sum(dtype=jnp.float32)

    if n_main < total_n:
        # Leftover rows that don't fill a full tile + sub-128 tail: tiny, plain jnp.
        xr = x_flat[n_main:].astype(jnp.float32)
        tr = t_flat[n_main:].astype(jnp.float32)
        tail = _focal_pointwise(xr, tr, alpha=alpha, gamma=gamma, in_kernel=False)
        total = total + tail.sum(dtype=jnp.float32)

    return total / jnp.float32(total_n)


def focal_loss_ref(inputs, targets, alpha=0.25, gamma=2.0):
    x = inputs.astype(jnp.float32)
    t = targets.astype(jnp.float32)
    p = jax.nn.sigmoid(x)
    ce = jnp.maximum(x, 0.0) - x * t + jnp.log1p(jnp.exp(-jnp.abs(x)))
    p_t = p * t + (1.0 - p) * (1.0 - t)
    loss = ce * (1.0 - p_t) ** gamma
    if alpha >= 0:
        alpha_t = alpha * t + (1.0 - alpha) * (1.0 - t)
        loss = alpha_t * loss
    return loss.mean()


if __name__ == "__main__":
    key = jax.random.PRNGKey(0)
    k1, k2 = jax.random.split(key)

    # NCHW inputs, like the PyTorch module would receive.
    B, C, H, W = 2, 4, 16, 16
    logits = jax.random.normal(k1, (B, C, H, W), dtype=jnp.float32)
    targets = (jax.random.uniform(k2, (B, C, H, W)) > 0.5).astype(jnp.float32)

    loss_fn = jax.jit(functools.partial(focal_loss, alpha=0.25, gamma=2.0))
    out = loss_fn(logits, targets)
    out = jax.block_until_ready(out)

    ref = focal_loss_ref(logits, targets, alpha=0.25, gamma=2.0)
    assert jnp.allclose(out, ref, rtol=1e-5, atol=1e-6), (out, ref)

    print("KERNEL_OK")
</pallas_src>

<mosaic_0001>
module attributes {stable_mosaic.version = 11 : i64} {
  func.func @_focal_loss_kernel(%arg0: i32, %arg1: i32, %arg2: memref<8x128xf32, #tpu.memory_space<vmem>>, %arg3: memref<8x128xf32, #tpu.memory_space<vmem>>, %arg4: memref<1x1x8x128xf32, #tpu.memory_space<vmem>>) attributes {dimension_semantics = [#tpu.dimension_semantics<parallel>, #tpu.dimension_semantics<arbitrary>], iteration_bounds = array<i64: 2, 1>, scalar_prefetch = 0 : i64, scratch_operands = 0 : i64, tpu.core_type = #tpu.core_type<tc>, window_params = [{transform_indices = @transform_0, window_bounds = array<i64: 8, 128>}, {transform_indices = @transform_1, window_bounds = array<i64: 8, 128>}, {transform_indices = @transform_2, window_bounds = array<i64: 1, 1, 8, 128>}]} {
    %c0_i32 = arith.constant 0 : i32
    %0 = arith.cmpi eq, %arg1, %c0_i32 : i32
    %1 = arith.extui %0 : i1 to i32
    %c0_i32_0 = arith.constant 0 : i32
    %2 = arith.cmpi ne, %1, %c0_i32_0 : i32
    scf.if %2 {
      %cst_20 = arith.constant 0.000000e+00 : f32
      %41 = vector.broadcast %cst_20 : f32 to vector<1x1x8x128xf32>
      %c0_21 = arith.constant 0 : index
      %c0_22 = arith.constant 0 : index
      %c0_23 = arith.constant 0 : index
      %c0_24 = arith.constant 0 : index
      %42 = vector.load %arg4[%c0_21, %c0_22, %c0_23, %c0_24] : memref<1x1x8x128xf32, #tpu.memory_space<vmem>>, vector<1x1x8x128xf32>
      tpu.vector_store %arg4[%c0_21, %c0_22, %c0_23, %c0_24], %41 {strides = array<i32>} : memref<1x1x8x128xf32, #tpu.memory_space<vmem>>, vector<1x1x8x128xf32>,
    } else {
    }
    %c0 = arith.constant 0 : index
    %c0_1 = arith.constant 0 : index
    %3 = vector.load %arg2[%c0, %c0_1] : memref<8x128xf32, #tpu.memory_space<vmem>>, vector<8x128xf32>
    %c0_2 = arith.constant 0 : index
    %c0_3 = arith.constant 0 : index
    %4 = vector.load %arg3[%c0_2, %c0_3] : memref<8x128xf32, #tpu.memory_space<vmem>>, vector<8x128xf32>
    %5 = math.absf %3 : vector<8x128xf32>
    %cst = arith.constant 0.000000e+00 : f32
    %6 = vector.broadcast %cst : f32 to vector<8x128xf32>
    %7 = arith.subf %6, %5 : vector<8x128xf32>
    %8 = math.exp %7 : vector<8x128xf32>
    %cst_4 = arith.constant 0.000000e+00 : f32
    %9 = vector.broadcast %cst_4 : f32 to vector<8x128xf32>
    %10 = arith.maximumf %3, %9 : vector<8x128xf32>
    %11 = arith.mulf %3, %4 : vector<8x128xf32>
    %12 = arith.subf %10, %11 : vector<8x128xf32>
    %13 = math.log1p %8 : vector<8x128xf32>
    %14 = arith.addf %12, %13 : vector<8x128xf32>
    %cst_5 = arith.constant 1.000000e+00 : f32
    %15 = vector.broadcast %cst_5 : f32 to vector<8x128xf32>
    %16 = arith.addf %15, %8 : vector<8x128xf32>
    %17 = tpu.reciprocal %16 : vector<8x128xf32> -> vector<8x128xf32>
    %cst_6 = arith.constant 0.000000e+00 : f32
    %18 = vector.broadcast %cst_6 : f32 to vector<8x128xf32>
    %19 = arith.cmpf oge, %3, %18 : vector<8x128xf32>
    %cst_7 = arith.constant 1.000000e+00 : f32
    %20 = vector.broadcast %cst_7 : f32 to vector<8x128xf32>
    %21 = arith.select %19, %20, %8 : vector<8x128xi1>, vector<8x128xf32>
    %22 = arith.mulf %21, %17 : vector<8x128xf32>
    %23 = arith.addf %22, %4 : vector<8x128xf32>
    %cst_8 = arith.constant 2.000000e+00 : f32
    %24 = vector.broadcast %cst_8 : f32 to vector<8x128xf32>
    %25 = arith.mulf %24, %22 : vector<8x128xf32>
    %26 = arith.mulf %25, %4 : vector<8x128xf32>
    %27 = arith.subf %23, %26 : vector<8x128xf32>
    %28 = arith.mulf %27, %27 : vector<8x128xf32>
    %29 = arith.mulf %14, %28 : vector<8x128xf32>
    %cst_9 = arith.constant -5.000000e-01 : f32
    %30 = vector.broadcast %cst_9 : f32 to vector<8x128xf32>
    %31 = arith.mulf %30, %4 : vector<8x128xf32>
    %cst_10 = arith.constant 7.500000e-01 : f32
    %32 = vector.broadcast %cst_10 : f32 to vector<8x128xf32>
    %33 = arith.addf %32, %31 : vector<8x128xf32>
    %34 = arith.mulf %33, %29 : vector<8x128xf32>
    %35 = vector.shape_cast %34 : vector<8x128xf32> to vector<1x1x8x128xf32>
    %cst_11 = arith.constant dense<0.000000e+00> : vector<1x8x128xf32>
    %36 = vector.multi_reduction <add>, %35, %cst_11 [0] : vector<1x1x8x128xf32> to vector<1x8x128xf32>
    %c0_12 = arith.constant 0 : index
    %c0_13 = arith.constant 0 : index
    %c0_14 = arith.constant 0 : index
    %c0_15 = arith.constant 0 : index
    %37 = vector.load %arg4[%c0_12, %c0_13, %c0_14, %c0_15] : memref<1x1x8x128xf32, #tpu.memory_space<vmem>>, vector<1x1x8x128xf32>
    %38 = vector.shape_cast %36 : vector<1x8x128xf32> to vector<1x1x8x128xf32>
    %39 = arith.addf %37, %38 : vector<1x1x8x128xf32>
    %c0_16 = arith.constant 0 : index
    %c0_17 = arith.constant 0 : index
    %c0_18 = arith.constant 0 : index
    %c0_19 = arith.constant 0 : index
    %40 = vector.load %arg4[%c0_16, %c0_17, %c0_18, %c0_19] : memref<1x1x8x128xf32, #tpu.memory_space<vmem>>, vector<1x1x8x128xf32>
    tpu.vector_store %arg4[%c0_16, %c0_17, %c0_18, %c0_19], %39 {strides = array<i32>} : memref<1x1x8x128xf32, #tpu.memory_space<vmem>>, vector<1x1x8x128xf32>,
    return
  }
  func.func @transform_0(%arg0: i32, %arg1: i32) -> (i32, i32) {
    %c1_i32 = arith.constant 1 : i32
    %0 = arith.muli %arg0, %c1_i32 : i32
    %1 = arith.addi %0, %arg1 : i32
    %c0_i32 = arith.constant 0 : i32
    %c0_i32_0 = arith.constant 0 : i32
    return %1, %c0_i32 : i32, i32
  }
  func.func @transform_1(%arg0: i32, %arg1: i32) -> (i32, i32) {
    %c1_i32 = arith.constant 1 : i32
    %0 = arith.muli %arg0, %c1_i32 : i32
    %1 = arith.addi %0, %arg1 : i32
    %c0_i32 = arith.constant 0 : i32
    %c0_i32_0 = arith.constant 0 : i32
    return %1, %c0_i32 : i32, i32
  }
  func.func @transform_2(%arg0: i32, %arg1: i32) -> (i32, i32, i32, i32) {
    %c0_i32 = arith.constant 0 : i32
    %c0_i32_0 = arith.constant 0 : i32
    %c0_i32_1 = arith.constant 0 : i32
    %c0_i32_2 = arith.constant 0 : i32
    return %arg0, %c0_i32, %c0_i32_0, %c0_i32_1 : i32, i32, i32, i32
  }
}

</mosaic_0001>

<bundles_post_ra>
// kernel: focal_loss.1
= control target key start
LH: loop header
LB: loop body
LE: loop exit
PB: predicated region body
PF: predicated region fallthrough
CT: control target
= control target key end

     0   :  { %s377_s9 = smov 0   ;;  %s379_s10 = smov 0   ;;  %s418_s0 = inlined_call_operand.vmem [shape: f32[16,128], index: 0, kind: input, shape index: {}]   ;;  %s419_s1 = inlined_call_operand.vmem [shape: f32[16,128], index: 1, kind: input, shape index: {}]   ;;  %s420_s2 = inlined_call_operand.vmem [shape: f32[2,1,8,128], index: 2, kind: output, shape index: {}]  }
   0x1   :  { %s381_s11 = smov 0  }
   0x2 LB: > { %s24_s12 = sadd.s32 1, %s356_s10  ;;  %p301_p0 = scmp.ge.s32.totalorder %s360_s11, 1  ;;  %s360_s11 = sphi %s381_s11, %s12_s11   ;;  %s356_s10 = sphi %s379_s10, %s422_s10   ;;  %s352_s9 = sphi %s377_s9, %s421_s9  }
   0x3   : > { %p26_p1 = scmp.ge.s32.totalorder %s24_s12, 2  ;;  %p140_p2 = scmp.lt.s32.totalorder %s360_s11, 3 }
   0x5   : > { %s424_s12 = smov (%p26_p1, %s24_s12), 0  ;;  %p141_p3 = pnand %p301_p0, %p140_p2 }
   0x6   : > { %p167_p4 = scmp.lt.s32.totalorder (!%p141_p3), %s352_s9, 1 }
   0x7   : > { %144 = sbr.rel (%p141_p3) target bundleno = 63 (0x3f), region = 28 }
   0xe   : > { %s426_s9 = smov (!%p167_p4, %s352_s9), 1 }
   0xf   : > { %s395_s13 = sshll.u32 %s426_s9, 3 }
  0x10   : > { %s170_s16 = scalar_lea.vmem %s418_s0, %s395_s13  ;;  %s176_s19 = scalar_lea.vmem %s419_s1, %s395_s13 }
  0x11   : > { %v187_v0 = vld [vmem:[%s170_s16] sm:$0xff]  ;;  %s181_s22 = scalar_lea.vmem %s420_s2, %s395_s13 }
  0x12   : > { %v189_v1 = vand.u32 2147483647, %v187_v0  ;;  %vm208_vm0 = vcmp.ge.f32.partialorder %v187_v0, 0.0  ;;  %v188_v7 = vld [vmem:[%s176_s19] sm:$0xff]  ;;  %v193_v11 = vmax.f32 %v187_v0, 0.0 }
  0x13   : > { %v194_v12 = vmul.f32 %v188_v7, %v187_v0  ;;  %v217_v23 = vmul.f32 -0.5, %v188_v7 }
  0x14   : > { %v190_v2 = vsub.f32 0.0, %v189_v1 }
  0x15   : > { %v195_v20 = vsub.f32 %v193_v11, %v194_v12  ;;  %v218_v27 = vadd.f32 0.75, %v217_v23 }
  0x16   : > { %v191_v3 = vmul.f32 1.442695, %v190_v2 }
  0x18   : > { %332 = vpow2.f32 %v191_v3 }
  0x22   : > { %v333_v4 = vpop.eup %332 }
  0x23   : > { %v196_v5 = vadd.f32 1.0, %v333_v4  ;;  %v199_v6 = vmul.f32 -0.5, %v333_v4  ;;  %v202_v9 = vand.u32 2147483647, %v333_v4  ;;  %v209_v10 = vsel %vm208_vm0, 1.0, %v333_v4 }
  0x25   : > { %334 = vrcp.f32 %v196_v5  ;;  %v200_v8 = vadd.f32 1.0, %v199_v6  ;;  %vm203_vm1 = vcmp.lt.f32.partialorder %v202_v9, 0.0004427343 }
  0x26   : > { %336 = vlog2.f32 %v196_v5 }
  0x27   : > { %v201_v14 = vmul.f32 %v333_v4, %v200_v8 }
  0x2f   : > { %v335_v13 = vpop.eup %334 }
  0x30   : > { %v337_v15 = vpop.eup %336  ;;  %v210_v16 = vmul.f32 %v335_v13, %v209_v10 }
  0x31   : > { %v198_v17 = vmul.f32 0.6931472, %v337_v15 }
  0x32   : > { %v211_v18 = vadd.f32 %v210_v16, %v188_v7  ;;  %v212_v19 = vmul.f32 2.0, %v210_v16 }
  0x33   : > { %v204_v21 = vsel %vm203_vm1, %v201_v14, %v198_v17 }
  0x34   : > { %v213_v22 = vmul.f32 %v212_v19, %v188_v7  ;;  %v205_v24 = vadd.f32 %v204_v21, %v195_v20 }
  0x36   : > { %v214_v25 = vsub.f32 %v211_v18, %v213_v22 }
  0x38   : > { %v215_v26 = vmul.f32 %v214_v25, %v214_v25 }
  0x3a   : > { %v216_v28 = vmul.f32 %v215_v26, %v205_v24 }
  0x3c   : > { %v219_v29 = vmul.f32 %v218_v27, %v216_v28 }
  0x3e   : > { %223 = vst [vmem:[%s181_s22] sm:$0xff] %v219_v29 }
  0x3f PF: > { %s12_s11 = sadd.s32 1, %s360_s11   ;;  %s421_s9 = smov %s356_s10 }
  0x40   : > { %p9_p5 = scmp.ge.s32.totalorder %s12_s11, 4   ;;  %s422_s10 = smov %s424_s12 }
  0x42   :  { %11 = sbr.rel (!%p9_p5) target bundleno = 2 (0x2), region = 65 }

</bundles_post_ra>
